<compile_context>
chip_gen: v7x
topology: tpu7x:2x2x1
jax: 0.10.0
libtpu: 0.0.40
codegen_flags: <defaults>
</compile_context>

<pallas_src>
import functools
import math

import jax
import jax.numpy as jnp
from jax.experimental import pallas as pl
from jax.experimental.pallas import tpu as pltpu

NEG_PAD = float(-2.0 ** 32 + 1)  # Python float -> weak-typed literal, never a captured const


def _sa_pool_kernel(x_ref, mk_ref, mq_ref, pos_ref,
                    wk_ref, bk_ref, wv_ref, bv_ref, wq_ref, bq_ref,
                    wf_ref, bf_ref, out_ref, *, num_heads, head_dim, seq_len,
                    block_b):
    E = num_heads * head_dim
    L = seq_len
    TB = block_b
    scale = 1.0 / math.sqrt(head_dim)

    # Position add + fused Q/K/V projections over the whole (TB*L, E) row slab.
    x = (x_ref[...] + pos_ref[...]).reshape(TB * L, E)                  # bf16
    key = jnp.dot(x, wk_ref[...], preferred_element_type=jnp.float32) + bk_ref[...]
    value = jnp.dot(x, wv_ref[...], preferred_element_type=jnp.float32) + bv_ref[...]
    query = jnp.dot(x, wq_ref[...], preferred_element_type=jnp.float32) + bq_ref[...]

    q3 = (query * scale).astype(jnp.bfloat16).reshape(TB, L, E)
    k3 = key.astype(jnp.bfloat16).reshape(TB, L, E)
    v3 = value.astype(jnp.bfloat16).reshape(TB, L, E)

    # Additive key-side mask bias (no transpose, no [L,L] select). Query-side
    # masking is intentionally dropped: padded query rows get multiplied by 0
    # in the masked mean below, so the pooled output is identical.
    mk = mk_ref[...]                                                    # (TB, 1, L) f32
    key_bias = (1.0 - mk) * NEG_PAD                                     # (TB, 1, L)

    wf = wf_ref[...]                                                    # (E, E) bf16
    out = bf_ref[...]                                                   # (1, E) f32, broadcasts
    for h in range(num_heads):
        lo = h * head_dim
        hi = lo + head_dim
        q_h = q3[:, :, lo:hi]                                           # (TB, L, hd) bf16
        k_h = k3[:, :, lo:hi]
        v_h = v3[:, :, lo:hi]

        s = jnp.einsum('bqd,bkd->bqk', q_h, k_h,
                       preferred_element_type=jnp.float32) + key_bias   # (TB, L, L) f32
        s_max = jnp.max(s, axis=-1, keepdims=True)
        p = jnp.exp(s - s_max)
        p = p * pl.reciprocal(jnp.sum(p, axis=-1, keepdims=True), approx=True)

        ctx_h = jnp.einsum('bqk,bkd->bqd', p.astype(jnp.bfloat16), v_h,
                           preferred_element_type=jnp.float32)          # (TB, L, hd) f32
        # Fused "unshape + final_linear": ctx @ Wf == sum_h ctx_h @ Wf[h*hd:(h+1)*hd]
        out = out + jnp.dot(ctx_h.reshape(TB * L, head_dim).astype(jnp.bfloat16),
                            wf[lo:hi, :], preferred_element_type=jnp.float32)
    out = out.reshape(TB, L, E)

    # Masked mean pooling over the sequence axis.
    fm = mq_ref[...]                                                    # (TB, L, 1) f32
    lens = jnp.sum(mk, axis=2)                                          # (TB, 1)
    pooled = jnp.sum(out * fm, axis=1)                                  # (TB, E)
    pooled = pooled * pl.reciprocal(lens + 1e-8, approx=True)
    out_ref[...] = pooled.reshape(1, TB, E)                             # lane-dense slab


def _choose_block_b(batch, seq_len):
    """How many sequences to fuse per grid step (must divide batch).

    Targets ~128 fused rows (block_b * L) so projections fill the MXU row
    dimension, but prefers >= 2 grid steps so both v7x TensorCores get work.
    """
    target = max(1, 128 // max(seq_len, 1))
    divisors = [d for d in range(1, batch + 1) if batch % d == 0]
    candidates = [d for d in divisors if d <= target] or [1]
    block_b = max(candidates)
    if batch // block_b < 2:
        smaller = [d for d in candidates if batch // d >= 2]
        if smaller:
            block_b = max(smaller)
    return block_b


def self_attention_pooling(x, mask, pos, wk_t, bk, wv_t, bv, wq_t, bq,
                           wf_t, bf, *, num_heads):
    """x: [B, L, E] f32; mask: [B, L] (1.0 valid / 0.0 pad); pos: [L, E].

    Linear weights are passed pre-transposed ([in, out]) and biases as [1, E],
    so the kernel computes x @ W_t + b (== torch's x @ W.T + b). Returns [B, E].
    """
    B, L, E = x.shape
    assert E % num_heads == 0
    head_dim = E // num_heads
    block_b = _choose_block_b(B, L)
    grid_b = B // block_b

    # bf16 matmul operands (f32 accumulation inside the kernel); biases stay f32.
    to_bf16 = lambda a: a.astype(jnp.bfloat16)
    x_bf, pos_bf = to_bf16(x), to_bf16(pos)
    wk_bf, wv_bf, wq_bf, wf_bf = map(to_bf16, (wk_t, wv_t, wq_t, wf_t))

    mask_f = mask.astype(jnp.float32)
    mask_k = mask_f.reshape(B, 1, L)   # lane-major: additive key bias, lengths
    mask_q = mask_f.reshape(B, L, 1)   # row-major: masked-mean weights

    kernel = functools.partial(_sa_pool_kernel, num_heads=num_heads,
                               head_dim=head_dim, seq_len=L, block_b=block_b)

    def invariant(shape):
        return pl.BlockSpec(shape, lambda b: (0,) * len(shape))

    grid_spec = pltpu.PrefetchScalarGridSpec(
        num_scalar_prefetch=0,
        grid=(grid_b,),
        in_specs=[
            pl.BlockSpec((block_b, L, E), lambda b: (b, 0, 0)),   # x
            pl.BlockSpec((block_b, 1, L), lambda b: (b, 0, 0)),   # mask (key layout)
            pl.BlockSpec((block_b, L, 1), lambda b: (b, 0, 0)),   # mask (row layout)
            invariant((L, E)),                                    # position encoding
            invariant((E, E)), invariant((1, E)),                 # Wk_t, bk
            invariant((E, E)), invariant((1, E)),                 # Wv_t, bv
            invariant((E, E)), invariant((1, E)),                 # Wq_t, bq
            invariant((E, E)), invariant((1, E)),                 # Wf_t, bf
        ],
        out_specs=pl.BlockSpec((1, block_b, E), lambda b: (b, 0, 0)),
    )

    flops = 8 * B * L * E * E + 4 * B * num_heads * L * L * head_dim
    transcendentals = B * num_heads * L * L
    bytes_accessed = (2 * B * L * E + 2 * L * E + 4 * (2 * E * E + 4 * E)
                      + 2 * 4 * B * L + 4 * B * E)
    cost = pl.CostEstimate(flops=flops, transcendentals=transcendentals,
                           bytes_accessed=bytes_accessed)

    out = pl.pallas_call(
        kernel,
        out_shape=jax.ShapeDtypeStruct((grid_b, block_b, E), jnp.float32),
        grid_spec=grid_spec,
        compiler_params=pltpu.CompilerParams(dimension_semantics=("parallel",)),
        cost_estimate=cost,
    )(x_bf, mask_k, mask_q, pos_bf, wk_bf, bk, wv_bf, bv, wq_bf, bq, wf_bf, bf)
    return out.reshape(B, E)


def reference_forward(x, mask_f, pos, wk_t, bk, wv_t, bv, wq_t, bq, wf_t, bf,
                      *, num_heads, quant=None):
    """Pure-JAX replica of the PyTorch forward (dropout = identity).

    quant=None reproduces the module in fp32. Passing a bf16 round-trip as
    `quant` rounds operands at the same points as the Pallas kernel, giving a
    tight numerical cross-check of the bf16/f32-accumulate kernel.
    """
    r = (lambda a: a) if quant is None else quant
    hp = jax.lax.Precision.HIGHEST
    B, L, E = x.shape
    hd = E // num_heads
    scale = 1.0 / math.sqrt(hd)

    xp = r(r(x) + r(pos)[None, :, :])
    key = jnp.matmul(xp, r(wk_t), precision=hp) + bk
    value = jnp.matmul(xp, r(wv_t), precision=hp) + bv
    query = jnp.matmul(xp, r(wq_t), precision=hp) + bq

    def shape(t):
        return jnp.transpose(t.reshape(B, L, num_heads, hd), (0, 2, 1, 3))

    q, k, v = shape(r(query * scale)), shape(r(key)), shape(r(value))
    scores = jnp.einsum('bhqd,bhkd->bhqk', q, k, precision=hp)
    valid = mask_f > 0.5
    scores = jnp.where(valid[:, None, :, None], scores, NEG_PAD)  # query positions
    scores = jnp.where(valid[:, None, None, :], scores, NEG_PAD)  # key positions
    attn = jax.nn.softmax(scores, axis=-1)
    ctx = jnp.einsum('bhqk,bhkd->bhqd', r(attn), v, precision=hp)
    ctx = jnp.transpose(ctx, (0, 2, 1, 3)).reshape(B, L, E)
    out = jnp.matmul(r(ctx), r(wf_t), precision=hp) + bf
    fm = mask_f[:, :, None]
    lens = jnp.sum(fm, axis=1)
    return jnp.sum(out * fm, axis=1) / (lens + 1e-8)


if __name__ == "__main__":
    B, L, E = 2, 8, 32
    num_heads = 2

    key0 = jax.random.PRNGKey(0)
    keys = jax.random.split(key0, 10)

    x = jax.random.normal(keys[0], (B, L, E), dtype=jnp.float32)
    # mask: batch 0 fully valid, batch 1 has its last 3 positions padded.
    mask = jnp.stack([
        jnp.ones((L,), jnp.float32),
        jnp.concatenate([jnp.ones((5,), jnp.float32), jnp.zeros((3,), jnp.float32)]),
    ], axis=0)
    pos = jax.random.normal(keys[1], (L, E), dtype=jnp.float32)  # position_encoding[0]

    def linear_params(kw, kb):
        bound = 1.0 / math.sqrt(E)
        w = jax.random.uniform(kw, (E, E), jnp.float32, -bound, bound)  # torch [out, in]
        b = jax.random.uniform(kb, (E,), jnp.float32, -bound, bound)
        return w.T, b.reshape(1, E)                                     # [in, out], [1, E]

    wk_t, bk = linear_params(keys[2], keys[3])
    wv_t, bv = linear_params(keys[4], keys[5])
    wq_t, bq = linear_params(keys[6], keys[7])
    wf_t, bf = linear_params(keys[8], keys[9])

    out = self_attention_pooling(x, mask, pos, wk_t, bk, wv_t, bv, wq_t, bq,
                                 wf_t, bf, num_heads=num_heads)
    out = jax.block_until_ready(out)
    assert out.shape == (B, E)

    # Tight check: reference with bf16 rounding at the same points as the kernel.
    bf16_round = lambda a: a.astype(jnp.bfloat16).astype(jnp.float32)
    ref_mirror = reference_forward(x, mask, pos, wk_t, bk, wv_t, bv, wq_t, bq,
                                   wf_t, bf, num_heads=num_heads, quant=bf16_round)
    assert jnp.allclose(out, ref_mirror, rtol=3e-2, atol=3e-2), (out, ref_mirror)

    # Loose sanity check against the exact fp32 module math.
    ref_fp32 = reference_forward(x, mask, pos, wk_t, bk, wv_t, bv, wq_t, bq,
                                 wf_t, bf, num_heads=num_heads)
    assert jnp.allclose(out, ref_fp32, rtol=2e-1, atol=2e-1), (out, ref_fp32)

    print("KERNEL_OK")
</pallas_src>

<mosaic_0001>
module attributes {stable_mosaic.version = 11 : i64} {
  func.func @_sa_pool_kernel(%arg0: i32, %arg1: memref<1x8x32xbf16, #tpu.memory_space<vmem>>, %arg2: memref<1x1x8xf32, #tpu.memory_space<vmem>>, %arg3: memref<1x8x1xf32, #tpu.memory_space<vmem>>, %arg4: memref<8x32xbf16, #tpu.memory_space<vmem>>, %arg5: memref<32x32xbf16, #tpu.memory_space<vmem>>, %arg6: memref<1x32xf32, #tpu.memory_space<vmem>>, %arg7: memref<32x32xbf16, #tpu.memory_space<vmem>>, %arg8: memref<1x32xf32, #tpu.memory_space<vmem>>, %arg9: memref<32x32xbf16, #tpu.memory_space<vmem>>, %arg10: memref<1x32xf32, #tpu.memory_space<vmem>>, %arg11: memref<32x32xbf16, #tpu.memory_space<vmem>>, %arg12: memref<1x32xf32, #tpu.memory_space<vmem>>, %arg13: memref<1x1x32xf32, #tpu.memory_space<vmem>>) attributes {dimension_semantics = [#tpu.dimension_semantics<parallel>], iteration_bounds = array<i64: 2>, scalar_prefetch = 0 : i64, scratch_operands = 0 : i64, tpu.core_type = #tpu.core_type<tc>, window_params = [{transform_indices = @transform_0, window_bounds = array<i64: 1, 8, 32>}, {transform_indices = @transform_1, window_bounds = array<i64: 1, 1, 8>}, {transform_indices = @transform_2, window_bounds = array<i64: 1, 8, 1>}, {pipeline_mode = #tpu.pipeline_mode<synchronous>, transform_indices = @transform_3, window_bounds = array<i64: 8, 32>}, {pipeline_mode = #tpu.pipeline_mode<synchronous>, transform_indices = @transform_4, window_bounds = array<i64: 32, 32>}, {pipeline_mode = #tpu.pipeline_mode<synchronous>, transform_indices = @transform_5, window_bounds = array<i64: 1, 32>}, {pipeline_mode = #tpu.pipeline_mode<synchronous>, transform_indices = @transform_6, window_bounds = array<i64: 32, 32>}, {pipeline_mode = #tpu.pipeline_mode<synchronous>, transform_indices = @transform_7, window_bounds = array<i64: 1, 32>}, {pipeline_mode = #tpu.pipeline_mode<synchronous>, transform_indices = @transform_8, window_bounds = array<i64: 32, 32>}, {pipeline_mode = #tpu.pipeline_mode<synchronous>, transform_indices = @transform_9, window_bounds = array<i64: 1, 32>}, {pipeline_mode = #tpu.pipeline_mode<synchronous>, transform_indices = @transform_10, window_bounds = array<i64: 32, 32>}, {pipeline_mode = #tpu.pipeline_mode<synchronous>, transform_indices = @transform_11, window_bounds = array<i64: 1, 32>}, {transform_indices = @transform_12, window_bounds = array<i64: 1, 1, 32>}]} {
    %c0 = arith.constant 0 : index
    %c0_0 = arith.constant 0 : index
    %c0_1 = arith.constant 0 : index
    %0 = vector.load %arg1[%c0, %c0_0, %c0_1] : memref<1x8x32xbf16, #tpu.memory_space<vmem>>, vector<1x8x32xbf16>
    %c0_2 = arith.constant 0 : index
    %c0_3 = arith.constant 0 : index
    %1 = vector.load %arg4[%c0_2, %c0_3] : memref<8x32xbf16, #tpu.memory_space<vmem>>, vector<8x32xbf16>
    %2 = vector.shape_cast %1 : vector<8x32xbf16> to vector<1x8x32xbf16>
    %3 = arith.addf %0, %2 : vector<1x8x32xbf16>
    %4 = vector.shape_cast %3 : vector<1x8x32xbf16> to vector<8x32xbf16>
    %c0_4 = arith.constant 0 : index
    %c0_5 = arith.constant 0 : index
    %5 = vector.load %arg5[%c0_4, %c0_5] : memref<32x32xbf16, #tpu.memory_space<vmem>>, vector<32x32xbf16>
    %cst = arith.constant dense<0.000000e+00> : vector<8x32xf32>
    %6 = tpu.matmul %4, %5, %cst {dimension_numbers = #tpu.dot_dimension_numbers<[1], [0], [0], [1], [0, 0, 1, 1], [], []>} : vector<8x32xbf16>, vector<32x32xbf16>, vector<8x32xf32> -> vector<8x32xf32>
    %c0_6 = arith.constant 0 : index
    %c0_7 = arith.constant 0 : index
    %7 = vector.load %arg6[%c0_6, %c0_7] : memref<1x32xf32, #tpu.memory_space<vmem>>, vector<1x32xf32>
    %8 = vector.broadcast %7 : vector<1x32xf32> to vector<8x32xf32>
    %9 = arith.addf %6, %8 : vector<8x32xf32>
    %c0_8 = arith.constant 0 : index
    %c0_9 = arith.constant 0 : index
    %10 = vector.load %arg7[%c0_8, %c0_9] : memref<32x32xbf16, #tpu.memory_space<vmem>>, vector<32x32xbf16>
    %cst_10 = arith.constant dense<0.000000e+00> : vector<8x32xf32>
    %11 = tpu.matmul %4, %10, %cst_10 {dimension_numbers = #tpu.dot_dimension_numbers<[1], [0], [0], [1], [0, 0, 1, 1], [], []>} : vector<8x32xbf16>, vector<32x32xbf16>, vector<8x32xf32> -> vector<8x32xf32>
    %c0_11 = arith.constant 0 : index
    %c0_12 = arith.constant 0 : index
    %12 = vector.load %arg8[%c0_11, %c0_12] : memref<1x32xf32, #tpu.memory_space<vmem>>, vector<1x32xf32>
    %13 = vector.broadcast %12 : vector<1x32xf32> to vector<8x32xf32>
    %14 = arith.addf %11, %13 : vector<8x32xf32>
    %c0_13 = arith.constant 0 : index
    %c0_14 = arith.constant 0 : index
    %15 = vector.load %arg9[%c0_13, %c0_14] : memref<32x32xbf16, #tpu.memory_space<vmem>>, vector<32x32xbf16>
    %cst_15 = arith.constant dense<0.000000e+00> : vector<8x32xf32>
    %16 = tpu.matmul %4, %15, %cst_15 {dimension_numbers = #tpu.dot_dimension_numbers<[1], [0], [0], [1], [0, 0, 1, 1], [], []>} : vector<8x32xbf16>, vector<32x32xbf16>, vector<8x32xf32> -> vector<8x32xf32>
    %c0_16 = arith.constant 0 : index
    %c0_17 = arith.constant 0 : index
    %17 = vector.load %arg10[%c0_16, %c0_17] : memref<1x32xf32, #tpu.memory_space<vmem>>, vector<1x32xf32>
    %18 = vector.broadcast %17 : vector<1x32xf32> to vector<8x32xf32>
    %19 = arith.addf %16, %18 : vector<8x32xf32>
    %cst_18 = arith.constant 2.500000e-01 : f32
    %20 = vector.broadcast %cst_18 : f32 to vector<8x32xf32>
    %21 = arith.mulf %19, %20 : vector<8x32xf32>
    %22 = arith.truncf %21 : vector<8x32xf32> to vector<8x32xbf16>
    %23 = vector.shape_cast %22 : vector<8x32xbf16> to vector<1x8x32xbf16>
    %24 = arith.truncf %9 : vector<8x32xf32> to vector<8x32xbf16>
    %25 = vector.shape_cast %24 : vector<8x32xbf16> to vector<1x8x32xbf16>
    %26 = arith.truncf %14 : vector<8x32xf32> to vector<8x32xbf16>
    %27 = vector.shape_cast %26 : vector<8x32xbf16> to vector<1x8x32xbf16>
    %c0_19 = arith.constant 0 : index
    %c0_20 = arith.constant 0 : index
    %c0_21 = arith.constant 0 : index
    %28 = vector.load %arg2[%c0_19, %c0_20, %c0_21] : memref<1x1x8xf32, #tpu.memory_space<vmem>>, vector<1x1x8xf32>
    %cst_22 = arith.constant 1.000000e+00 : f32
    %29 = vector.broadcast %cst_22 : f32 to vector<1x1x8xf32>
    %30 = arith.subf %29, %28 : vector<1x1x8xf32>
    %cst_23 = arith.constant -4.2949673E+9 : f32
    %31 = vector.broadcast %cst_23 : f32 to vector<1x1x8xf32>
    %32 = arith.mulf %30, %31 : vector<1x1x8xf32>
    %c0_24 = arith.constant 0 : index
    %c0_25 = arith.constant 0 : index
    %33 = vector.load %arg11[%c0_24, %c0_25] : memref<32x32xbf16, #tpu.memory_space<vmem>>, vector<32x32xbf16>
    %c0_26 = arith.constant 0 : index
    %c0_27 = arith.constant 0 : index
    %34 = vector.load %arg12[%c0_26, %c0_27] : memref<1x32xf32, #tpu.memory_space<vmem>>, vector<1x32xf32>
    %35 = vector.extract_strided_slice %23 {offsets = [0, 0, 0], sizes = [1, 8, 16], strides = [1, 1, 1]} : vector<1x8x32xbf16> to vector<1x8x16xbf16>
    %36 = vector.extract_strided_slice %25 {offsets = [0, 0, 0], sizes = [1, 8, 16], strides = [1, 1, 1]} : vector<1x8x32xbf16> to vector<1x8x16xbf16>
    %37 = vector.extract_strided_slice %27 {offsets = [0, 0, 0], sizes = [1, 8, 16], strides = [1, 1, 1]} : vector<1x8x32xbf16> to vector<1x8x16xbf16>
    "tpu.trace_start"() <{level = 10 : i32, message = "bqd,bkd->bqk"}> : () -> ()
    %cst_28 = arith.constant dense<0.000000e+00> : vector<1x8x8xf32>
    %38 = tpu.matmul %35, %36, %cst_28 {dimension_numbers = #tpu.dot_dimension_numbers<[2], [2], [1], [1], [0, 0, 0, 1, 1, 1], [0], [0]>} : vector<1x8x16xbf16>, vector<1x8x16xbf16>, vector<1x8x8xf32> -> vector<1x8x8xf32>
    "tpu.trace_stop"() : () -> ()
    %39 = vector.broadcast %32 : vector<1x1x8xf32> to vector<1x8x8xf32>
    %40 = arith.addf %38, %39 : vector<1x8x8xf32>
    %cst_29 = arith.constant dense<0xFF800000> : vector<1x8xf32>
    %41 = vector.multi_reduction <maximumf>, %40, %cst_29 [2] : vector<1x8x8xf32> to vector<1x8xf32>
    %42 = vector.shape_cast %41 : vector<1x8xf32> to vector<1x8x1xf32>
    %43 = vector.broadcast %42 : vector<1x8x1xf32> to vector<1x8x8xf32>
    %44 = arith.subf %40, %43 : vector<1x8x8xf32>
    %45 = math.exp %44 : vector<1x8x8xf32>
    %cst_30 = arith.constant dense<0.000000e+00> : vector<1x8xf32>
    %46 = vector.multi_reduction <add>, %45, %cst_30 [2] : vector<1x8x8xf32> to vector<1x8xf32>
    %47 = vector.shape_cast %46 : vector<1x8xf32> to vector<1x8x1xf32>
    %48 = tpu.reciprocal %47 {approx = true} : vector<1x8x1xf32> -> vector<1x8x1xf32>
    %49 = vector.broadcast %48 : vector<1x8x1xf32> to vector<1x8x8xf32>
    %50 = arith.mulf %45, %49 : vector<1x8x8xf32>
    %51 = arith.truncf %50 : vector<1x8x8xf32> to vector<1x8x8xbf16>
    "tpu.trace_start"() <{level = 10 : i32, message = "bqk,bkd->bqd"}> : () -> ()
    %cst_31 = arith.constant dense<0.000000e+00> : vector<1x8x16xf32>
    %52 = tpu.matmul %51, %37, %cst_31 {dimension_numbers = #tpu.dot_dimension_numbers<[2], [1], [1], [2], [0, 0, 0, 1, 1, 2], [0], [0]>} : vector<1x8x8xbf16>, vector<1x8x16xbf16>, vector<1x8x16xf32> -> vector<1x8x16xf32>
    "tpu.trace_stop"() : () -> ()
    %53 = vector.shape_cast %52 : vector<1x8x16xf32> to vector<8x16xf32>
    %54 = arith.truncf %53 : vector<8x16xf32> to vector<8x16xbf16>
    %55 = vector.extract_strided_slice %33 {offsets = [0, 0], sizes = [16, 32], strides = [1, 1]} : vector<32x32xbf16> to vector<16x32xbf16>
    %cst_32 = arith.constant dense<0.000000e+00> : vector<8x32xf32>
    %56 = tpu.matmul %54, %55, %cst_32 {dimension_numbers = #tpu.dot_dimension_numbers<[1], [0], [0], [1], [0, 0, 1, 1], [], []>} : vector<8x16xbf16>, vector<16x32xbf16>, vector<8x32xf32> -> vector<8x32xf32>
    %57 = vector.broadcast %34 : vector<1x32xf32> to vector<8x32xf32>
    %58 = arith.addf %57, %56 : vector<8x32xf32>
    %59 = vector.extract_strided_slice %23 {offsets = [0, 0, 16], sizes = [1, 8, 16], strides = [1, 1, 1]} : vector<1x8x32xbf16> to vector<1x8x16xbf16>
    %60 = vector.extract_strided_slice %25 {offsets = [0, 0, 16], sizes = [1, 8, 16], strides = [1, 1, 1]} : vector<1x8x32xbf16> to vector<1x8x16xbf16>
    %61 = vector.extract_strided_slice %27 {offsets = [0, 0, 16], sizes = [1, 8, 16], strides = [1, 1, 1]} : vector<1x8x32xbf16> to vector<1x8x16xbf16>
    "tpu.trace_start"() <{level = 10 : i32, message = "bqd,bkd->bqk"}> : () -> ()
    %cst_33 = arith.constant dense<0.000000e+00> : vector<1x8x8xf32>
    %62 = tpu.matmul %59, %60, %cst_33 {dimension_numbers = #tpu.dot_dimension_numbers<[2], [2], [1], [1], [0, 0, 0, 1, 1, 1], [0], [0]>} : vector<1x8x16xbf16>, vector<1x8x16xbf16>, vector<1x8x8xf32> -> vector<1x8x8xf32>
    "tpu.trace_stop"() : () -> ()
    %63 = vector.broadcast %32 : vector<1x1x8xf32> to vector<1x8x8xf32>
    %64 = arith.addf %62, %63 : vector<1x8x8xf32>
    %cst_34 = arith.constant dense<0xFF800000> : vector<1x8xf32>
    %65 = vector.multi_reduction <maximumf>, %64, %cst_34 [2] : vector<1x8x8xf32> to vector<1x8xf32>
    %66 = vector.shape_cast %65 : vector<1x8xf32> to vector<1x8x1xf32>
    %67 = vector.broadcast %66 : vector<1x8x1xf32> to vector<1x8x8xf32>
    %68 = arith.subf %64, %67 : vector<1x8x8xf32>
    %69 = math.exp %68 : vector<1x8x8xf32>
    %cst_35 = arith.constant dense<0.000000e+00> : vector<1x8xf32>
    %70 = vector.multi_reduction <add>, %69, %cst_35 [2] : vector<1x8x8xf32> to vector<1x8xf32>
    %71 = vector.shape_cast %70 : vector<1x8xf32> to vector<1x8x1xf32>
    %72 = tpu.reciprocal %71 {approx = true} : vector<1x8x1xf32> -> vector<1x8x1xf32>
    %73 = vector.broadcast %72 : vector<1x8x1xf32> to vector<1x8x8xf32>
    %74 = arith.mulf %69, %73 : vector<1x8x8xf32>
    %75 = arith.truncf %74 : vector<1x8x8xf32> to vector<1x8x8xbf16>
    "tpu.trace_start"() <{level = 10 : i32, message = "bqk,bkd->bqd"}> : () -> ()
    %cst_36 = arith.constant dense<0.000000e+00> : vector<1x8x16xf32>
    %76 = tpu.matmul %75, %61, %cst_36 {dimension_numbers = #tpu.dot_dimension_numbers<[2], [1], [1], [2], [0, 0, 0, 1, 1, 2], [0], [0]>} : vector<1x8x8xbf16>, vector<1x8x16xbf16>, vector<1x8x16xf32> -> vector<1x8x16xf32>
    "tpu.trace_stop"() : () -> ()
    %77 = vector.shape_cast %76 : vector<1x8x16xf32> to vector<8x16xf32>
    %78 = arith.truncf %77 : vector<8x16xf32> to vector<8x16xbf16>
    %79 = vector.extract_strided_slice %33 {offsets = [16, 0], sizes = [16, 32], strides = [1, 1]} : vector<32x32xbf16> to vector<16x32xbf16>
    %cst_37 = arith.constant dense<0.000000e+00> : vector<8x32xf32>
    %80 = tpu.matmul %78, %79, %cst_37 {dimension_numbers = #tpu.dot_dimension_numbers<[1], [0], [0], [1], [0, 0, 1, 1], [], []>} : vector<8x16xbf16>, vector<16x32xbf16>, vector<8x32xf32> -> vector<8x32xf32>
    %81 = arith.addf %58, %80 : vector<8x32xf32>
    %82 = vector.shape_cast %81 : vector<8x32xf32> to vector<1x8x32xf32>
    %c0_38 = arith.constant 0 : index
    %c0_39 = arith.constant 0 : index
    %c0_40 = arith.constant 0 : index
    %83 = vector.load %arg3[%c0_38, %c0_39, %c0_40] : memref<1x8x1xf32, #tpu.memory_space<vmem>>, vector<1x8x1xf32>
    %cst_41 = arith.constant dense<0.000000e+00> : vector<1x1xf32>
    %84 = vector.multi_reduction <add>, %28, %cst_41 [2] : vector<1x1x8xf32> to vector<1x1xf32>
    %85 = vector.broadcast %83 : vector<1x8x1xf32> to vector<1x8x32xf32>
    %86 = arith.mulf %82, %85 : vector<1x8x32xf32>
    %cst_42 = arith.constant dense<0.000000e+00> : vector<1x32xf32>
    %87 = vector.multi_reduction <add>, %86, %cst_42 [1] : vector<1x8x32xf32> to vector<1x32xf32>
    %cst_43 = arith.constant 9.99999993E-9 : f32
    %88 = vector.broadcast %cst_43 : f32 to vector<1x1xf32>
    %89 = arith.addf %84, %88 : vector<1x1xf32>
    %90 = tpu.reciprocal %89 {approx = true} : vector<1x1xf32> -> vector<1x1xf32>
    %91 = vector.broadcast %90 : vector<1x1xf32> to vector<1x32xf32>
    %92 = arith.mulf %87, %91 : vector<1x32xf32>
    %93 = vector.shape_cast %92 : vector<1x32xf32> to vector<1x1x32xf32>
    %c0_44 = arith.constant 0 : index
    %c0_45 = arith.constant 0 : index
    %c0_46 = arith.constant 0 : index
    %94 = vector.load %arg13[%c0_44, %c0_45, %c0_46] : memref<1x1x32xf32, #tpu.memory_space<vmem>>, vector<1x1x32xf32>
    tpu.vector_store %arg13[%c0_44, %c0_45, %c0_46], %93 {strides = array<i32>} : memref<1x1x32xf32, #tpu.memory_space<vmem>>, vector<1x1x32xf32>,
    return
  }
  func.func @transform_0(%arg0: i32) -> (i32, i32, i32) {
    %c0_i32 = arith.constant 0 : i32
    %c0_i32_0 = arith.constant 0 : i32
    %c0_i32_1 = arith.constant 0 : i32
    return %arg0, %c0_i32, %c0_i32_0 : i32, i32, i32
  }
  func.func @transform_1(%arg0: i32) -> (i32, i32, i32) {
    %c0_i32 = arith.constant 0 : i32
    %c0_i32_0 = arith.constant 0 : i32
    %c0_i32_1 = arith.constant 0 : i32
    return %arg0, %c0_i32, %c0_i32_0 : i32, i32, i32
  }
  func.func @transform_2(%arg0: i32) -> (i32, i32, i32) {
    %c0_i32 = arith.constant 0 : i32
    %c0_i32_0 = arith.constant 0 : i32
    %c0_i32_1 = arith.constant 0 : i32
    return %arg0, %c0_i32, %c0_i32_0 : i32, i32, i32
  }
  func.func @transform_3(%arg0: i32) -> (i32, i32) {
    %c0_i32 = arith.constant 0 : i32
    %c0_i32_0 = arith.constant 0 : i32
    %c0_i32_1 = arith.constant 0 : i32
    return %c0_i32, %c0_i32_0 : i32, i32
  }
  func.func @transform_4(%arg0: i32) -> (i32, i32) {
    %c0_i32 = arith.constant 0 : i32
    %c0_i32_0 = arith.constant 0 : i32
    %c0_i32_1 = arith.constant 0 : i32
    return %c0_i32, %c0_i32_0 : i32, i32
  }
  func.func @transform_5(%arg0: i32) -> (i32, i32) {
    %c0_i32 = arith.constant 0 : i32
    %c0_i32_0 = arith.constant 0 : i32
    %c0_i32_1 = arith.constant 0 : i32
    return %c0_i32, %c0_i32_0 : i32, i32
  }
  func.func @transform_6(%arg0: i32) -> (i32, i32) {
    %c0_i32 = arith.constant 0 : i32
    %c0_i32_0 = arith.constant 0 : i32
    %c0_i32_1 = arith.constant 0 : i32
    return %c0_i32, %c0_i32_0 : i32, i32
  }
  func.func @transform_7(%arg0: i32) -> (i32, i32) {
    %c0_i32 = arith.constant 0 : i32
    %c0_i32_0 = arith.constant 0 : i32
    %c0_i32_1 = arith.constant 0 : i32
    return %c0_i32, %c0_i32_0 : i32, i32
  }
  func.func @transform_8(%arg0: i32) -> (i32, i32) {
    %c0_i32 = arith.constant 0 : i32
    %c0_i32_0 = arith.constant 0 : i32
    %c0_i32_1 = arith.constant 0 : i32
    return %c0_i32, %c0_i32_0 : i32, i32
  }
  func.func @transform_9(%arg0: i32) -> (i32, i32) {
    %c0_i32 = arith.constant 0 : i32
    %c0_i32_0 = arith.constant 0 : i32
    %c0_i32_1 = arith.constant 0 : i32
    return %c0_i32, %c0_i32_0 : i32, i32
  }
  func.func @transform_10(%arg0: i32) -> (i32, i32) {
    %c0_i32 = arith.constant 0 : i32
    %c0_i32_0 = arith.constant 0 : i32
    %c0_i32_1 = arith.constant 0 : i32
    return %c0_i32, %c0_i32_0 : i32, i32
  }
  func.func @transform_11(%arg0: i32) -> (i32, i32) {
    %c0_i32 = arith.constant 0 : i32
    %c0_i32_0 = arith.constant 0 : i32
    %c0_i32_1 = arith.constant 0 : i32
    return %c0_i32, %c0_i32_0 : i32, i32
  }
  func.func @transform_12(%arg0: i32) -> (i32, i32, i32) {
    %c0_i32 = arith.constant 0 : i32
    %c0_i32_0 = arith.constant 0 : i32
    %c0_i32_1 = arith.constant 0 : i32
    return %arg0, %c0_i32, %c0_i32_0 : i32, i32, i32
  }
}

</mosaic_0001>

<bundles_post_ra>
// kernel: tpu_custom_call.1
= control target key start
LH: loop header
LB: loop body
LE: loop exit
PB: predicated region body
PF: predicated region fallthrough
CT: control target
= control target key end

     0   :  { %s2244_s0 = inlined_call_operand.hbm [shape: bf16[2,8,32], index: 0, kind: input, shape index: {}]   ;;  %s2245_s1 = inlined_call_operand.hbm [shape: f32[2,1,8], index: 1, kind: input, shape index: {}]   ;;  %s2246_s2 = inlined_call_operand.vmem [shape: f32[2,8,1], index: 2, kind: input, shape index: {}]   ;;  %s2247_s3 = inlined_call_operand.hbm [shape: bf16[8,32], index: 3, kind: input, shape index: {}]   ;;  %s2248_s4 = inlined_call_operand.vmem [shape: bf16[32,32], index: 4, kind: input, shape index: {}]   ;;  %s2249_s5 = inlined_call_operand.hbm [shape: f32[1,32], index: 5, kind: input, shape index: {}]   ;;  %s2250_s6 = inlined_call_operand.vmem [shape: bf16[32,32], index: 6, kind: input, shape index: {}]   ;;  %s2251_s7 = inlined_call_operand.hbm [shape: f32[1,32], index: 7, kind: input, shape index: {}]   ;;  %s2252_s8 = inlined_call_operand.vmem [shape: bf16[32,32], index: 8, kind: input, shape index: {}]   ;;  %s2253_s9 = inlined_call_operand.vmem [shape: f32[1,32], index: 9, kind: input, shape index: {}]   ;;  %s2254_s10 = inlined_call_operand.hbm [shape: bf16[32,32], index: 10, kind: input, shape index: {}]   ;;  %s2255_s11 = inlined_call_operand.vmem [shape: f32[1,32], index: 11, kind: input, shape index: {}]   ;;  %s2256_s12 = inlined_call_operand.hbm [shape: f32[2,1,32], index: 12, kind: output, shape index: {}]  }
   0x1   :  { %2262 = sst [smem:[#allocation20_spill]] %s2244_s0 }
   0x2   :  { %2263 = sst [smem:[#allocation21_spill]] %s2246_s2 }
   0x3   :  { %2264 = sst [smem:[#allocation22_spill]] %s2247_s3 }
   0x4   :  { %2265 = sst [smem:[#allocation23_spill]] %s2249_s5 }
   0x5   :  { %2266 = sst [smem:[#allocation24_spill]] %s2251_s7 }
   0x6   :  { %2267 = sst [smem:[#allocation25_spill]] %s2255_s11 }
   0x7   :  { %2268 = sst [smem:[#allocation26_spill]] %s2256_s12 }
   0x8   :  { %17 = vsyncpa [#allocation3], 0 }
   0x9   :  { %19 = vsyncpa [#allocation3 + $0x1], 0 }
   0xa   :  { %20 = vsyncpa [#allocation6], 0 }
   0xb   :  { %22 = vsyncpa [#allocation6 + $0x1], 0 }
   0xc   :  { %23 = vsyncpa [#allocation9], 0 }
   0xd   :  { %24 = vsyncpa [#allocation12], 0 }
   0xe   :  { %25 = vsyncpa [#allocation4], 0 }
   0xf   :  { %27 = vsyncpa [#allocation4 + $0x1], 0  ;;  %s1825_s21 = smov 0   ;;  %s1827_s22 = smov 0  }
  0x10   :  { %s1829_s23 = smov 0   ;;  %s1831_s24 = smov 0  }
  0x11 LB: > { %s1747_s25 = smov [#allocation7]   ;;  %s1846_s27 = sadd.s32 4294967295, %s1745_s24   ;;  %s1745_s24 = sphi %s1831_s24, %s2300_s24   ;;  %s1741_s23 = sphi %s1829_s23, %s2299_s23   ;;  %s1737_s22 = sphi %s1827_s22, %s2298_s22   ;;  %s1733_s21 = sphi %s1825_s21, %s2297_s21  }
  0x12   : > { %s344_s26 = sshll.u32 %s1747_s25, 4  ;;  %p1247_p0 = scmp.ge.s32.totalorder %s1745_s24, 1  ;;  %s1851_s26 = int_to_ptr.vmem [resolvable:$true] %s344_s26 }
  0x13   : > { %p2258_p1 = scmp.eq.s32.totalorder %s1846_s27, 0  ;;  %p331_p2 = scmp.lt.s32.totalorder %s1745_s24, 3 }
  0x14   : > { %s1748_s29 = smov [#allocation8]   ;;  %s1749_s13 = smov [#allocation10]  }
  0x15   : > { %p1853_p3 = pnand %p1247_p0, %p331_p2  ;;  %s358_s30 = sshll.u32 %s1748_s29, 4  ;;  %s1860_s30 = int_to_ptr.vmem [resolvable:$true] %s358_s30 }
  0x16   : > { %s372_s14 = sshll.u32 %s1749_s13, 4  ;;  %s1750_s16 = smov [#allocation11]   ;;  %s1868_s14 = int_to_ptr.vmem [resolvable:$true] %s372_s14 }
  0x17   : > { %s2269_s28 = scalar_select %p1853_p3, 1, 0 }
  0x18   : > { %p1395_p5 = pneg %p1853_p3  ;;  %s1870_s17 = sshll.u32 %s1750_s16, 4  ;;  %s389_s17 = int_to_ptr.vmem [resolvable:$true] %s1870_s17 }
  0x19   : > { %s2271_s3 = sld [smem:[#allocation22_spill]] }
  0x1a   : > { %p1864_p6 = pnand %p1395_p5, %p2258_p1 }
  0x1c   : > { %p1880_p8 = pneg %p1864_p6 }
  0x1f   : > { %s1491_s20 = scalar_lea.hbm %s2271_s3, 64 }
  0x20   : > { %p1492_p7 = scmp.ne.s32.totalorder %s2271_s3, %s1491_s20  ;;  %p1498_p11 = scmp.lt.u32.totalorder %s1491_s20, %s2271_s3 }
  0x22   : > { %p1494_p9 = pnand %p1880_p8, %p1492_p7 }
  0x24   : > { %p1495_p10 = pneg %p1494_p9 }
  0x26   : > { %p1500_p12 = pnand %p1498_p11, %p1495_p10 }
  0x28   : > { %1503 = shalt.err (!%p1500_p12)
}
  0x29   : > { %s1504_s18 = scalar_lea.vmem %s1851_s26, 64  ;;  %p1512_p5 = scmp.lt.s32.totalorder %s1851_s26, %s1851_s26 }
  0x2a   : > { %p1505_p13 = scmp.ne.s32.totalorder %s1851_s26, %s1504_s18  ;;  %p1513_p4 = scmp.lt.s32.totalorder %s1504_s18, %s1504_s18 }
  0x2c   : > { %p1507_p0 = pnand %p1505_p13, %p1880_p8  ;;  %p1514_p7 = por %p1513_p4, %p1512_p5 }
  0x2e   : > { %p1508_p2 = pneg %p1507_p0 }
  0x30   : > { %p1515_p9 = pnand %p1514_p7, %p1508_p2 }
  0x32   : > { %1518 = shalt.err (!%p1515_p9)
}
  0x33   : > { %1398 = dma.hbm_to_vmem [thread:$0]  (!%p1864_p6), %s2271_s3, 64, %s1851_s26, [#allocation6]  }
  0x34   : > { %s2273_s5 = sld [smem:[#allocation23_spill]] }
  0x3a   : > { %s1519_s29 = scalar_lea.hbm %s2273_s5, 16 }
  0x3b   : > { %p1520_p10 = scmp.ne.s32.totalorder %s2273_s5, %s1519_s29  ;;  %p1526_p12 = scmp.lt.u32.totalorder %s1519_s29, %s2273_s5 }
  0x3d   : > { %p1522_p4 = pnand %p1520_p10, %p1880_p8 }
  0x3f   : > { %p1523_p11 = pneg %p1522_p4 }
  0x41   : > { %p1528_p13 = pnand %p1526_p12, %p1523_p11 }
  0x43   : > { %1531 = shalt.err (!%p1528_p13)
}
  0x44   : > { %s1532_s26 = scalar_lea.vmem %s1860_s30, 16  ;;  %s1539_s11 = scalar_lea.vmem %s1860_s30, 32 }
  0x45   : > { %p1533_p0 = scmp.ne.s32.totalorder %s1860_s30, %s1532_s26  ;;  %p1540_p7 = scmp.lt.s32.totalorder %s1860_s30, %s1860_s30 }
  0x46   : > { %p1541_p9 = scmp.lt.s32.totalorder %s1539_s11, %s1532_s26 }
  0x47   : > { %p1535_p2 = pnand %p1533_p0, %p1880_p8 }
  0x48   : > { %p1542_p10 = por %p1541_p9, %p1540_p7 }
  0x49   : > { %p1536_p5 = pneg %p1535_p2 }
  0x4b   : > { %p1543_p4 = pnand %p1542_p10, %p1536_p5 }
  0x4d   : > { %1546 = shalt.err (!%p1543_p4)
}
  0x4e   : > { %1401 = dma.hbm_to_vmem [thread:$0]  (!%p1864_p6), %s2273_s5, 16, %s1860_s30, [#allocation9]  }
  0x4f   : > { %s2274_s7 = sld [smem:[#allocation24_spill]] }
  0x55   : > { %s1547_s25 = scalar_lea.hbm %s2274_s7, 16 }
  0x56   : > { %p1548_p11 = scmp.ne.s32.totalorder %s2274_s7, %s1547_s25  ;;  %p1554_p0 = scmp.lt.u32.totalorder %s1547_s25, %s2274_s7 }
  0x58   : > { %p1550_p12 = pnand %p1548_p11, %p1880_p8 }
  0x5a   : > { %p1551_p13 = pneg %p1550_p12 }
  0x5c   : > { %p1556_p2 = pnand %p1554_p0, %p1551_p13 }
  0x5e   : > { %1559 = shalt.err (!%p1556_p2)
}
  0x5f   : > { %s1560_s30 = scalar_lea.vmem %s1868_s14, 16  ;;  %s1567_s11 = scalar_lea.vmem %s1868_s14, 32 }
  0x60   : > { %p1561_p5 = scmp.ne.s32.totalorder %s1868_s14, %s1560_s30  ;;  %p1568_p10 = scmp.lt.s32.totalorder %s1868_s14, %s1868_s14 }
  0x61   : > { %p1569_p4 = scmp.lt.s32.totalorder %s1567_s11, %s1560_s30 }
  0x62   : > { %p1563_p7 = pnand %p1561_p5, %p1880_p8 }
  0x63   : > { %p1570_p11 = por %p1569_p4, %p1568_p10 }
  0x64   : > { %p1564_p9 = pneg %p1563_p7 }
  0x66   : > { %p1571_p12 = pnand %p1570_p11, %p1564_p9 }
  0x68   : > { %1574 = shalt.err (!%p1571_p12)
}
  0x69   : > { %1404 = dma.hbm_to_vmem [thread:$0]  (!%p1864_p6), %s2274_s7, 16, %s1868_s14, [#allocation9]  }
  0x6a   : > { %s1575_s25 = scalar_lea.hbm %s2254_s10, 256 }
  0x6b   : > { %p1576_p13 = scmp.ne.s32.totalorder %s2254_s10, %s1575_s25  ;;  %p1582_p5 = scmp.lt.u32.totalorder %s1575_s25, %s2254_s10 }
  0x6d   : > { %p1578_p0 = pnand %p1576_p13, %p1880_p8 }
  0x6f   : > { %p1579_p2 = pneg %p1578_p0 }
  0x71   : > { %p1584_p7 = pnand %p1582_p5, %p1579_p2 }
  0x73   : > { %1587 = shalt.err (!%p1584_p7)
}
  0x74   : > { %s1588_s30 = scalar_lea.vmem %s389_s17, 256  ;;  %p1596_p11 = scmp.lt.s32.totalorder %s389_s17, %s389_s17 }
  0x75   : > { %p1589_p9 = scmp.ne.s32.totalorder %s389_s17, %s1588_s30  ;;  %p1597_p12 = scmp.lt.s32.totalorder %s1588_s30, %s1588_s30 }
  0x77   : > { %p1591_p10 = pnand %p1589_p9, %p1880_p8  ;;  %p1598_p1 = por %p1597_p12, %p1596_p11 }
  0x79   : > { %p1592_p4 = pneg %p1591_p10 }
  0x7b   : > { %p1599_p3 = pnand %p1598_p1, %p1592_p4 }
  0x7d   : > { %1602 = shalt.err (!%p1599_p3)
}
  0x7e   : > { %s1751_s14 = smov 64   ;;  %s1752_s13 = smov 4  }
  0x7f   : > { %1407 = dma.hbm_to_vmem [thread:$0]  (!%p1864_p6), %s2254_s10, 256, %s389_s17, [#allocation12], %s1751_s14, %s1751_s14, %s1752_s13  }
  0x80   : > { %s1246_s12 = sadd.s32 4294967294, %s1745_s24   ;;  %s1970_s19 = sadd.s32 1, %s1745_s24  }
  0x81   : > { %s37_s20 = ssub.s32 %s1745_s24, %s1970_s19  ;;  %s40_s25 = sadd.s32 1, %s1741_s23 }
  0x82   : > { %p38_p1 = scmp.eq.s32.totalorder %s37_s20, 0  ;;  %p47_p3 = scmp.ne.s32.totalorder %s1741_s23, %s1737_s22 }
  0x83   : > { %p48_p8 = scmp.eq.s32.totalorder %s1745_s24, 0  ;;  %p53_p13 = scmp.ne.s32.totalorder %s1737_s22, %s1733_s21 }
  0x84   : > { %s1981_s29 = scalar_select %p38_p1, %s1741_s23, %s40_s25  }
  0x85   : > { %p1983_p0 = por %p48_p8, %p47_p3  ;;  %p2276_p2 = scmp.eq.s32.totalorder %s1846_s27, 0 }
  0x86   : > { %p318_p5 = scmp.eq.s32.totalorder %s1846_s27, 1  ;;  %p324_p7 = scmp.eq.s32.totalorder %s1246_s12, 1 }
  0x87   : > { %p1989_p6 = por %p2276_p2, %p53_p13  ;;  %p1423_p9 = scmp.lt.s32.totalorder %s1745_s24, 2 }
  0x88   : > { %s1996_s16 = sand.u32 1, %s1741_s23   ;;  %p1998_p10 = por %p318_p5, %p47_p3 }
  0x89   : > { %s2277_s17 = scalar_select %p1989_p6, 1, 0 }
  0x8a   : > { %s2278_s18 = scalar_select %p1998_p10, 1, 0 }
  0x8b   : > { %p2002_p4 = por %p324_p7, %p53_p13  ;;  %s1253_s30 = sshll.u32 %s1996_s16, 2 }
  0x8c   : > { %s1254_s14 = sshll.u32 %s1745_s24, 6  ;;  %s2280_s0 = sld [smem:[#allocation20_spill]] }
  0x8d   : > { %s2279_s26 = scalar_select %p2002_p4, 1, 0 }
  0x8e   : > { %s409_s12 = scalar_lea.vmem [#allocation2], %s1253_s30  ;;  %p2017_p11 = pnand %p1423_p9, %p1983_p0 }
  0x8f   : > { %s416_s20 = sshll.u32 %s409_s12, 4  ;;  %s406_s5 = scalar_lea.sflag [#allocation3], %s1996_s16  ;;  %s2013_s20 = int_to_ptr.vmem [resolvable:$true] %s416_s20 }
  0x90   : > { %p1605_p1 = pneg %p2017_p11 }
  0x92   : > { %s2011_s2 = scalar_lea.hbm %s2280_s0, %s1254_s14  ;;  %s1608_s15 = scalar_lea.hbm %s2280_s0, 128 }
  0x93   : > { %s1603_s13 = scalar_lea.hbm %s2011_s2, 64  ;;  %p1609_p13 = scmp.lt.u32.totalorder %s2011_s2, %s2280_s0 }
  0x94   : > { %p1604_p12 = scmp.ne.s32.totalorder %s2011_s2, %s1603_s13  ;;  %p1610_p0 = scmp.lt.u32.totalorder %s1608_s15, %s1603_s13 }
  0x95   : > { %p1612_p5 = scmp.lt.u32.totalorder %s1603_s13, %s2011_s2 }
  0x96   : > { %p1606_p3 = pnand %p1605_p1, %p1604_p12  ;;  %p1611_p2 = por %p1610_p0, %p1609_p13 }
  0x98   : > { %p1607_p8 = pneg %p1606_p3  ;;  %p1613_p7 = por %p1612_p5, %p1611_p2 }
  0x9a   : > { %p1614_p9 = pnand %p1613_p7, %p1607_p8 }
  0x9c   : > { %1617 = shalt.err (!%p1614_p9)
}
  0x9d   : > { %s1618_s3 = scalar_lea.vmem %s2013_s20, 64  ;;  %s1753_s30 = smov [#allocation2]  }
  0x9e   : > { %p1619_p12 = scmp.ne.s32.totalorder %s2013_s20, %s1618_s3  ;;  %s1623_s14 = sshll.u32 %s1753_s30, 4  ;;  %s1624_s14 = int_to_ptr.vmem [resolvable:$false] %s1623_s14 }
  0x9f   : > { %s1625_s11 = scalar_lea.vmem %s1624_s14, 128  ;;  %p1626_p10 = scmp.lt.s32.totalorder %s2013_s20, %s1624_s14 }
  0xa0   : > { %p1621_p3 = pnand %p1619_p12, %p1605_p1  ;;  %p1627_p13 = scmp.lt.s32.totalorder %s1625_s11, %s1618_s3 }
  0xa2   : > { %p1622_p4 = pneg %p1621_p3  ;;  %p1628_p0 = por %p1627_p13, %p1626_p10 }
  0xa4   : > { %p1629_p2 = pnand %p1628_p0, %p1622_p4 }
  0xa6   : > { %1632 = shalt.err (!%p1629_p2)
}
  0xa7   : > { %1411 = dma.hbm_to_vmem [thread:$0]  (!%p2017_p11), %s2011_s2, 64, %s2013_s20, %s406_s5  }
  0xa8   : > { %s1255_s13 = sshll.u32 %s1745_s24, 4  ;;  %s426_s15 = scalar_lea.vmem [#allocation5], %s1996_s16 }
  0xa9   : > { %s433_s12 = sshll.u32 %s426_s15, 4  ;;  %s2053_s14 = scalar_lea.hbm %s2245_s1, %s1255_s13  ;;  %s434_s12 = int_to_ptr.vmem [resolvable:$true] %s433_s12 }
  0xaa   : > { %s2282_s3 = sand.u32 1, %s1745_s24   ;;  %s1633_s7 = scalar_lea.hbm %s2053_s14, 16 }
  0xab   : > { %s424_s11 = scalar_lea.sflag [#allocation6], %s2282_s3  ;;  %p1634_p10 = scmp.ne.s32.totalorder %s2053_s14, %s1633_s7 }
  0xac   : > { %s1638_s2 = scalar_lea.hbm %s2245_s1, 32  ;;  %p1639_p5 = scmp.lt.u32.totalorder %s2053_s14, %s2245_s1 }
  0xad   : > { %p1636_p4 = pnand %p1634_p10, %p1605_p1  ;;  %p1640_p7 = scmp.lt.u32.totalorder %s1638_s2, %s1633_s7 }
  0xae   : > { %p1642_p12 = scmp.lt.u32.totalorder %s1633_s7, %s2053_s14 }
  0xaf   : > { %p1637_p8 = pneg %p1636_p4  ;;  %p1641_p9 = por %p1640_p7, %p1639_p5 }
  0xb1   : > { %p1643_p3 = por %p1642_p12, %p1641_p9 }
  0xb3   : > { %p1644_p13 = pnand %p1643_p3, %p1637_p8 }
  0xb5   : > { %1647 = shalt.err (!%p1644_p13)
}
  0xb6   : > { %s1648_s13 = scalar_lea.vmem %s434_s12, 16  ;;  %s1754_s15 = smov [#allocation5]  }
  0xb7   : > { %p1649_p0 = scmp.ne.s32.totalorder %s434_s12, %s1648_s13  ;;  %s1653_s30 = sshll.u32 %s1754_s15, 4  ;;  %s1654_s30 = int_to_ptr.vmem [resolvable:$false] %s1653_s30 }
  0xb8   : > { %s1655_s3 = scalar_lea.vmem %s1654_s30, 32  ;;  %p1656_p4 = scmp.lt.s32.totalorder %s434_s12, %s1654_s30 }
  0xb9   : > { %p1651_p2 = pnand %p1649_p0, %p1605_p1  ;;  %p1657_p6 = scmp.lt.s32.totalorder %s1655_s3, %s1648_s13 }
  0xbb   : > { %p1652_p10 = pneg %p1651_p2  ;;  %p1658_p5 = por %p1657_p6, %p1656_p4 }
  0xbd   : > { %p1659_p7 = pnand %p1658_p5, %p1652_p10 }
  0xbf   : > { %1662 = shalt.err (!%p1659_p7)
}
  0xc0   : > { %1414 = dma.hbm_to_vmem [thread:$0]  (!%p2017_p11), %s2053_s14, 16, %s434_s12, %s424_s11  }
  0xc1   : > { %p2283_p8 = scmp.ne.s32.totalorder %s2269_s28, 0 }
  0xc2   : > { %s2079_s7 = sand.u32 (!%p2283_p8), 1, %s1737_s22   ;;  %p2284_p1 = scmp.ne.s32.totalorder (!%p2283_p8), %s2277_s17, 0 }
  0xc3   : > { %449 = sbr.rel (%p2283_p8) target bundleno = 1978 (0x7ba), region = 68  ;;  %s1257_s5 = sshll.u32 (!%p2283_p8), %s2079_s7, 2 }
  0xc4   : > { %s452_s16 = scalar_lea.sflag (!%p2283_p8), [#allocation3], %s2079_s7  ;;  %s455_s2 = scalar_lea.vmem (!%p2283_p8), [#allocation2], %s1257_s5 }
  0xca   : > { %1708 = dma.done.wait (%p2284_p1), %s452_s16, 64  }
  0xcb   : > { %1710 = vsyncadd (%p2284_p1), %s452_s16, 4294967232  ;;  %s460_s25 = sand.u32 1, %s1846_s27   ;;  %s463_s12 = scalar_lea.vmem [#allocation5], %s2079_s7 }
  0xcc   : > { %s461_s28 = scalar_lea.sflag [#allocation6], %s460_s25 }
  0xcd   : > { %1712 = dma.done.wait (%p2284_p1), %s461_s28, 16  }
  0xce   : > { %1714 = vsyncadd (%p2284_p1), %s461_s28, 4294967280  ;;  %p2285_p6 = scmp.eq.s32.totalorder %s1846_s27, 0 }
  0xd0   : > { %1716 = dma.done.wait (%p2285_p6), [#allocation6], 64   ;;  %p2286_p11 = pmov %p2285_p6 }
  0xd1   : > { %p2287_p9 = pmov %p2285_p6 }
  0xd2   : > { %1718 = vsyncadd (%p2286_p11), [#allocation6], 4294967232 }
  0xd3   : > { %1720 = dma.done.wait (%p2287_p9), [#allocation9], 32   ;;  %p2288_p12 = pmov %p2285_p6 }
  0xd4   : > { %p2289_p3 = pmov %p2285_p6 }
  0xd5   : > { %1722 = vsyncadd (%p2288_p12), [#allocation9], 4294967264 }
  0xd6   : > { %1724 = dma.done.wait (%p2289_p3), [#allocation12], 256   ;;  %p2290_p13 = pmov %p2289_p3 }
  0xd7   : > { %v1755_v0 = vmov 0.0   ;;  %vm1756_vm0 = vmmov 0   ;;  %v1473_v1 = vld [vmem:[%s2248_s4] sm:$0xff]   ;;  %v1474_v2 = vld [vmem:[%s2248_s4 + $0x8] sm:$0xff]   ;;  %vm558_vm1 = vcmask 261120   ;;  %vm746_vm2 = vcmask 130048  }
  0xd8   : > { %1726 = vsyncadd (%p2290_p13), [#allocation12], 4294967040  ;;  %1308 = vmatprep.subr.bf16.mxu0 %v1755_v0  ;;  %1312 = vmatprep.mubr.msk.bf16.mxu0 %vm1756_vm0, %v1755_v0  ;;  %v532_v3 = vld [vmem:[%s455_s2] sm:$0xf]  ;;  %v533_v4 = vld [vmem:[#allocation7] sm:$0xf]  ;;  %v741_v34 = vlaneseq }
  0xd9   : > { %1316 = vmatprep.subr.bf16.mxu1 %v1755_v0  ;;  %1320 = vmatprep.mubr.msk.bf16.mxu1 %vm1756_vm0, %v1755_v0  ;;  %v534_v5 = vadd.bf16 %v533_v4, %v532_v3  ;;  %v1477_v6 = vld [vmem:[%s2250_s6] sm:$0xff]   ;;  %v1478_v8 = vld [vmem:[%s2250_s6 + $0x8] sm:$0xff]   ;;  %v1267_v17 = vld [vmem:[#allocation10] ss:$0 sm:$0xff]  ;;  %s1757_s25 = smov 112   ;;  %vm809_vm3 = vcmask 1043456  }
  0xda   : > { %1309 = vmatpush3.bf16.msra.mxu0 %v1473_v1  ;;  %v1475_v7 = vld [vmem:[%s2252_s8] sm:$0xff]   ;;  %1317 = vmatpush3.bf16.msra.mxu1 %v1477_v6  ;;  %v1476_v9 = vld [vmem:[%s2252_s8 + $0x8] sm:$0xff]   ;;  %v742_v37 = vshrl.u32 %v741_v34, 7  ;;  %vm793_vm4 = vcmask 64512   ;;  %v1479_v59 = vld [vmem:[#allocation11] sm:$0xff]   ;;  %vm1075_vm5 = vcmask 57344  }
  0xdb   : > { %1310 = vmatprep.subr.bf16.mxu0 %v1755_v0  ;;  %1318 = vmatprep.subr.bf16.mxu1 %v1755_v0  ;;  %v1263_v10 = vld [vmem:[#allocation8] ss:$0 sm:$0xff]  ;;  %v1271_v20 = vld [vmem:[%s2253_s9] ss:$0 sm:$0xff]  ;;  %p527_p0 = scmp.lt.s32.totalorder %s1846_s27, 1  ;;  %s2291_s20 = sld [smem:[#allocation21_spill]] }
  0xdc   : > { %v2161_v35 = vld [vmem:[%s463_s12] sm:$0x1]  ;;  %v743_v39 = vsub.s32 0, %v742_v37  ;;  %s2292_s3 = sld [smem:[#allocation25_spill]]  ;;  %s1284_s5 = sshll.u32 %s1846_s27, 4  ;;  %vm1095_vm6 = vcmask 253952  }
  0xdd   : > { %v733_v36 = vsub.f32 1.0, %v2161_v35  ;;  %s528_s12 = scalar_select %p527_p0, %s1846_s27, 1 }
  0xde   : > { %1311 = vmatpush3.bf16.msra.mxu0 %v1474_v2  ;;  %1319 = vmatpush3.bf16.msra.mxu1 %v1478_v8  ;;  %s526_s16 = scalar_lea.vmem [#allocation13], %s2079_s7  ;;  %s2293_s17 = sld [smem:[#allocation26_spill]] }
  0xdf   : > { %1324 = vmatprep.subr.bf16.mxu0 %v1755_v0  ;;  %1332 = vmatprep.subr.bf16.mxu1 %v1755_v0  ;;  %v734_v38 = vmul.f32 -4.2949673e+09, %v733_v36  ;;  %s1262_s14 = sshll.u32 %s528_s12, 3  ;;  %s1110_s2 = sshll.u32 %s526_s16, 4  ;;  %s2202_s2 = int_to_ptr.vmem [resolvable:$true] %s1110_s2 }
  0xe0   : > { %s1663_s11 = scalar_lea.vmem %s2202_s2, 16  ;;  %p2294_p10 = scmp.ne.s32.totalorder %s2278_s18, 0 }
  0xe1   : > { %1313 = vmatmul.mubr.msk.bf16.vlgmr.msra.gmra.mrb[0].mxu0 %vm558_vm1, %v534_v5  ;;  %1321 = vmatmul.mubr.msk.bf16.vlgmr.msra.gmra.mrb[0].mxu1 %vm558_vm1, %v534_v5  ;;  %v744_v40 = vrot.slane %v734_v38, %v743_v39  ;;  %s530_s13 = scalar_lea.vmem %s2291_s20, %s1262_s14  ;;  %s1098_s14 = scalar_lea.sflag [#allocation4], %s2079_s7 }
  0xe2   : > { %1325 = vmatpush3.bf16.msra.mxu0 %v1475_v7  ;;  %1328 = vmatprep.mubr.msk.bf16.mxu0 %vm1756_vm0, %v1755_v0  ;;  %p1664_p2 = scmp.ne.s32.totalorder %s2202_s2, %s1663_s11  ;;  %s1759_s27 = smov [#allocation13]  }
  0xe3   : > { %1326 = vmatprep.subr.bf16.mxu0 %v1755_v0  ;;  %1334 = vmatprep.mubr.msk.bf16.mxu1 %vm1756_vm0, %v1755_v0  ;;  %s1667_s0 = sshll.u32 %s1759_s27, 4  ;;  %s1668_s0 = int_to_ptr.vmem [resolvable:$false] %s1667_s0 }
  0xe4   : > { %s2200_s12 = scalar_lea.hbm %s2293_s17, %s1284_s5  ;;  %p1665_p4 = pnand %p1664_p2, %p2294_p10 }
  0xe5   : > { %s1669_s20 = scalar_lea.vmem %s1668_s0, 32  ;;  %p1670_p7 = scmp.lt.s32.totalorder %s2202_s2, %s1668_s0 }
  0xe6   : > { %1327 = vmatpush3.bf16.msra.mxu0 %v1476_v9  ;;  %p1666_p5 = pneg %p1665_p4  ;;  %p1671_p8 = scmp.lt.s32.totalorder %s1669_s20, %s1663_s11 }
  0xe7   : > { %1338 = vmatprep.subr.bf16.mxu0 %v1755_v0 }
  0xe8   : > { %p1672_p1 = por %p1671_p8, %p1670_p7 }
  0xe9   : > { %1329 = vmatmul.mubr.msk.bf16.vlgmr.msra.gmra.mrb[4].mxu0 %vm558_vm1, %v534_v5 }
  0xea   : > { %1340 = vmatprep.mubr.msk.bf16.mxu0 %vm1756_vm0, %v1755_v0  ;;  %p1673_p6 = pnand %p1672_p1, %p1666_p5 }
 0x1b4   : > { %v596_v11 = vpop.f32.mrb[0].mxu0  ;;  %v659_v19 = vpop.f32.mrb[0].mxu1 }
 0x1b5   : > { %v597_v12 = vadd.f32 %v1263_v10, %v596_v11  ;;  %v1314_v13 = vpop.f32.mrb[1].mxu0  ;;  %v660_v21 = vadd.f32 %v1267_v17, %v659_v19  ;;  %v1322_v22 = vpop.f32.mrb[1].mxu1 }
 0x1b6   : > { %v599_v14 = vpop.f32.mrb[2].mxu0  ;;  %v662_v23 = vpop.f32.mrb[2].mxu1  ;;  %v1074_v22 = vld [vmem:[%s530_s13] sm:$0xff] }
 0x1b7   : > { %v730_v15 = vpack.c.bf16 %v597_v12, %v597_v12  ;;  %v1315_v16 = vpop.f32.mrb[3].mxu0  ;;  %v2150_v25 = vpack.c.bf16 %v660_v21, %v660_v21  ;;  %v1323_v26 = vpop.f32.mrb[3].mxu1  ;;  %v1758_v21 = vmov 0  }
 0x1b8   : > { %1471 = vset.pattern.permute.xlu1 %v1758_v21  ;;  %1472 = vset.pattern.permute.xlu0 %v1758_v21 }
 0x1b9   : > { %v751_v18 = vsel %vm746_vm2, %v730_v15, 0  ;;  %914 = vrot.lane.b32.xlu1 %v730_v15, %s1757_s25  ;;  %v811_v30 = vsel %vm809_vm3, %v2150_v25, 0 }
 0x1ba   : > { %1333 = vmatpush3.bf16.xpose.msra.mxu1 %v751_v18  ;;  %1339 = vmatpush3.bf16.msra.mxu0 %v811_v30  ;;  %v1480_v18 = vld [vmem:[#allocation11 + $0x8] sm:$0xff]  }
 0x1bb   : > { %1344 = vmatprep.subr.bf16.mxu1 %v1755_v0  ;;  %1350 = vmatprep.subr.bf16.mxu0 %v1755_v0 }
 0x1bc   : > { %v722_v24 = vpop.f32.mrb[4].mxu0 }
 0x1bd   : > { %v723_v27 = vadd.f32 %v1271_v20, %v722_v24  ;;  %v1330_v28 = vpop.f32.mrb[5].mxu0  ;;  %v1076_v20 = vsel %vm1075_vm5, %v2161_v35, 0.0 }
 0x1be   : > { %v725_v29 = vpop.f32.mrb[6].mxu0 }
 0x1bf   : > { %v728_v31 = vmul.f32 0.25, %v723_v27  ;;  %v1331_v32 = vpop.f32.mrb[7].mxu0  ;;  %v1279_v27 = vld [vmem:[%s2292_s3] ss:$0 sm:$0xff] }
 0x1c1   : > { %v729_v33 = vpack.c.bf16 %v728_v31, %v728_v31 }
 0x1c3   : > { %1335 = vmatmul.mubr.msk.bf16.vlgmr.msra.gmra.mrb[4].mxu1 %vm746_vm2, %v729_v33  ;;  %911 = vrot.lane.b32.xlu1 %v729_v33, %s1757_s25 }
 0x1c4   : > { %1346 = vmatprep.mubr.msk.bf16.mxu1 %vm1756_vm0, %v1755_v0  ;;  %1345 = vmatpush3.bf16.msra.mxu1 %v1479_v59 }
 0x1c5   : > { %1356 = vmatprep.subr.bf16.mxu1 %v1755_v0 }
 0x22b   : > { %v915_v55 = vpop.permute.xlu1 %914 }
 0x22c   : > { %v920_v57 = vsel %vm746_vm2, %v915_v55, 0 }
 0x235   : > { %v912_v58 = vpop.permute.xlu1 %911 }
 0x296   : > { %v787_v41 = vpop.f32.mrb[4].mxu1 }
 0x297   : > { %v788_v42 = vadd.f32 %v787_v41, %v744_v40  ;;  %v1336_v43 = vpop.f32.mrb[5].mxu1 }
 0x298   : > { %v790_v44 = vpop.f32.mrb[6].mxu1 }
 0x299   : > { %v1337_v45 = vpop.f32.mrb[7].mxu1  ;;  %v794_v46 = vsel %vm793_vm4, %v788_v42, -inf }
 0x29a   : > { %795 = vmax.xlane.f32.xlu0 %v794_v46 }
 0x327   : > { %v796_v47 = vpop.xlane.xlu0 %795 }
 0x328   : > { %v797_v48 = vsub.f32 %v788_v42, %v796_v47 }
 0x32a   : > { %v798_v49 = vmul.f32 1.442695, %v797_v48 }
 0x32c   : > { %1481 = vpow2.f32 %v798_v49 }
 0x336   : > { %v1482_v50 = vpop.eup %1481 }
 0x337   : > { %v800_v51 = vsel %vm793_vm4, %v1482_v50, 0.0 }
 0x338   : > { %801 = vadd.xlane.f32.xlu0 %v800_v51 }
 0x3c5   : > { %v802_v52 = vpop.xlane.xlu0 %801 }
 0x3c6   : > { %1483 = vrcp.f32 %v802_v52 }
 0x3d0   : > { %v1484_v53 = vpop.eup %1483 }
 0x3d1   : > { %v804_v54 = vmul.f32 %v1484_v53, %v1482_v50 }
 0x3d3   : > { %v805_v56 = vpack.c.bf16 %v804_v54, %v804_v54 }
 0x3d5   : > { %1341 = vmatmul.mubr.msk.bf16.vlgmr.msra.gmra.mrb[8].mxu0 %vm793_vm4, %v805_v56 }
 0x3d6   : > { %1351 = vmatpush3.bf16.xpose.msra.mxu0 %v920_v57  ;;  %1352 = vmatprep.mubr.msk.bf16.mxu0 %vm1756_vm0, %v1755_v0 }
 0x3dd   : > { %1353 = vmatmul.mubr.msk.bf16.vlgmr.msra.gmra.mrb[12].mxu0 %vm746_vm2, %v912_v58 }
 0x4a8   : > { %v847_v60 = vpop.f32.mrb[8].mxu0 }
 0x4a9   : > { %v853_v61 = vpack.c.bf16 %v847_v60, %v847_v60  ;;  %v1342_v62 = vpop.f32.mrb[9].mxu0 }
 0x4aa   : > { %v850_v63 = vpop.f32.mrb[10].mxu0 }
 0x4ab   : > { %v1343_v1 = vpop.f32.mrb[11].mxu0  ;;  %1347 = vmatmul.mubr.msk.bf16.vlgmr.msra.gmra.mrb[8].mxu1 %vm746_vm2, %v853_v61 }
 0x4ac   : > { %1358 = vmatprep.mubr.msk.bf16.mxu1 %vm1756_vm0, %v1755_v0 }
 0x4b0   : > { %v956_v2 = vpop.f32.mrb[12].mxu0 }
 0x4b1   : > { %v957_v3 = vadd.f32 %v956_v2, %v744_v40  ;;  %v1354_v4 = vpop.f32.mrb[13].mxu0 }
 0x4b2   : > { %v959_v5 = vpop.f32.mrb[14].mxu0 }
 0x4b3   : > { %v1355_v6 = vpop.f32.mrb[15].mxu0  ;;  %v962_v7 = vsel %vm793_vm4, %v957_v3, -inf }
 0x4b4   : > { %963 = vmax.xlane.f32.xlu0 %v962_v7 }
 0x4ca   : > { %975 = vrot.lane.b32.xlu0 %v2150_v25, %s1757_s25 }
 0x4e9   : > { %1077 = vadd.xlane.f32.xlu0 %v1076_v20 }
 0x541   : > { %v964_v8 = vpop.xlane.xlu0 %963 }
 0x542   : > { %v965_v9 = vsub.f32 %v957_v3, %v964_v8 }
 0x544   : > { %v966_v10 = vmul.f32 1.442695, %v965_v9 }
 0x545   : > { %v976_v11 = vpop.permute.xlu0 %975 }
 0x546   : > { %1485 = vpow2.f32 %v966_v10  ;;  %v981_v12 = vsel %vm809_vm3, %v976_v11, 0 }
 0x547   : > { %1357 = vmatpush3.bf16.msra.mxu1 %v981_v12 }
 0x548   : > { %1362 = vmatprep.subr.bf16.mxu1 %v1755_v0 }
 0x550   : > { %v1486_v13 = vpop.eup %1485 }
 0x551   : > { %v968_v14 = vsel %vm793_vm4, %v1486_v13, 0.0 }
 0x552   : > { %969 = vadd.xlane.f32.xlu1 %v968_v14 }
 0x563   : > { %1081 = vperm.xlu1 %1471, %v1074_v22  }
 0x576   : > { %v1078_v28 = vpop.xlane.xlu0 %1077 }
 0x577   : > { %v1092_v33 = vadd.f32 1e-08, %v1078_v28 }
 0x5df   : > { %v970_v15 = vpop.xlane.xlu1 %969 }
 0x5e0   : > { %1487 = vrcp.f32 %v970_v15 }
 0x5e1   : > { %1489 = vrcp.f32 %v1092_v33 }
 0x5e3   : > { %v1082_v30 = vpop.permute.xlu1 %1081 }
 0x5ea   : > { %v1488_v16 = vpop.eup %1487 }
 0x5eb   : > { %v972_v17 = vmul.f32 %v1488_v16, %v1486_v13  ;;  %v1490_v43 = vpop.eup %1489 }
 0x5ed   : > { %v973_v19 = vpack.c.bf16 %v972_v17, %v972_v17 }
 0x5ef   : > { %1359 = vmatmul.mubr.msk.bf16.vlgmr.msra.gmra.mrb[12].mxu1 %vm793_vm4, %v973_v19 }
 0x5f0   : > { %1363 = vmatpush3.bf16.msra.mxu1 %v1480_v18  ;;  %1364 = vmatprep.mubr.msk.bf16.mxu1 %vm1756_vm0, %v1755_v0 }
 0x6c2   : > { %v1017_v23 = vpop.f32.mrb[12].mxu1 }
 0x6c3   : > { %v1023_v24 = vpack.c.bf16 %v1017_v23, %v1017_v23  ;;  %v1360_v25 = vpop.f32.mrb[13].mxu1 }
 0x6c4   : > { %v1020_v0 = vpop.f32.mrb[14].mxu1 }
 0x6c5   : > { %v1361_v26 = vpop.f32.mrb[15].mxu1  ;;  %1365 = vmatmul.mubr.msk.bf16.vlgmr.msra.gmra.mrb[8].mxu1 %vm746_vm2, %v1023_v24 }
 0x798   : > { %v1067_v29 = vpop.f32.mrb[8].mxu1 }
 0x799   : > { %v1368_v31 = vadd.f32 %v1279_v27, %v1067_v29  ;;  %v1366_v32 = vpop.f32.mrb[9].mxu1 }
 0x79a   : > { %v1070_v34 = vpop.f32.mrb[10].mxu1 }
 0x79b   : > { %v1084_v35 = vmul.f32 %v1368_v31, %v1082_v30  ;;  %v1367_v36 = vpop.f32.mrb[11].mxu1 }
 0x79d   : > { %v1085_v37 = vsel %vm558_vm1, %v1084_v35, 0.0 }
 0x79e   : > { %v1086_v38 = vrot.slane %v1085_v37, 4 }
 0x7a0   : > { %v1087_v39 = vadd.f32 %v1086_v38, %v1085_v37 }
 0x7a2   : > { %v1088_v40 = vrot.slane %v1087_v39, 2 }
 0x7a4   : > { %v1089_v41 = vadd.f32 %v1088_v40, %v1087_v39 }
 0x7a6   : > { %v1090_v42 = vrot.slane %v1089_v41, 1 }
 0x7a8   : > { %v1091_v44 = vadd.f32 %v1090_v42, %v1089_v41 }
 0x7aa   : > { %v1094_v45 = vmul.f32 %v1490_v43, %v1091_v44 }
 0x7ac   : > { %1096 = vst.msk [vmem:[%s526_s16] sm:$0x1] %vm1095_vm6, %v1094_v45 }
 0x7ad   : > { %1676 = shalt.err (!%p1673_p6)
}
 0x7ae   : > { %s1677_s7 = scalar_lea.hbm %s2200_s12, 16  ;;  %s1681_s30 = scalar_lea.hbm %s2293_s17, 32 }
 0x7af   : > { %p1678_p11 = scmp.ne.s32.totalorder %s2200_s12, %s1677_s7  ;;  %p1682_p3 = scmp.lt.u32.totalorder %s2200_s12, %s2293_s17 }
 0x7b0   : > { %p1683_p13 = scmp.lt.u32.totalorder %s1681_s30, %s1677_s7  ;;  %p1685_p2 = scmp.lt.u32.totalorder %s1677_s7, %s2200_s12 }
 0x7b1   : > { %p1679_p9 = pnand %p1678_p11, %p2294_p10 }
 0x7b2   : > { %p1684_p0 = por %p1683_p13, %p1682_p3 }
 0x7b3   : > { %p1680_p12 = pneg %p1679_p9 }
 0x7b4   : > { %p1686_p4 = por %p1685_p2, %p1684_p0 }
 0x7b6   : > { %p1687_p5 = pnand %p1686_p4, %p1680_p12 }
 0x7b8   : > { %1690 = shalt.err (!%p1687_p5)
}
 0x7b9   : > { %1393 = dma.vmem_to_hbm [thread:$0]  (%p2294_p10), %s2202_s2, 16, %s2200_s12, %s1098_s14  }
 0x7ba PF: > { %s1122_s16 = sand.u32 1, %s1733_s21   ;;  %p2295_p7 = scmp.ne.s32.totalorder %s2279_s26, 0 }
 0x7bb   : > { %p2296_p8 = scmp.ge.s32.totalorder %s1745_s24, 2  ;;  %s1123_s25 = scalar_lea.sflag [#allocation4], %s1122_s16 }
 0x7bd   : > { %p1416_p1 = pnand %p2296_p8, %p2295_p7 }
 0x7bf   : > { %1728 = dma.done.wait (!%p1416_p1), %s1123_s25, 16  }
 0x7c0   : > { %1730 = vsyncadd (!%p1416_p1), %s1123_s25, 4294967280  ;;  %p30_p6 = scmp.ge.s32.totalorder %s1970_s19, 4   ;;  %s2297_s21 = smov %s1737_s22 }
 0x7c1   : > { %s2298_s22 = smov %s1741_s23  ;;  %s2299_s23 = smov %s1981_s29 }
 0x7c2   : > { %s2300_s24 = smov %s1970_s19  ;;  %32 = sbr.rel (!%p30_p6) target bundleno = 17 (0x11), region = 145 }
 0x7c9   :  { %1127 = vsyncpa [#allocation3], 1 }
 0x7ca   :  { %1129 = vsyncpa [#allocation3 + $0x1], 1 }
 0x7cb   :  { %1130 = vsyncpa [#allocation6], 1 }
 0x7cc   :  { %1132 = vsyncpa [#allocation6 + $0x1], 1 }
 0x7cd   :  { %1133 = vsyncpa [#allocation9], 1 }
 0x7ce   :  { %1134 = vsyncpa [#allocation12], 1 }
 0x7cf   :  { %1135 = vsyncpa [#allocation4], 1 }
 0x7d0   :  { %1137 = vsyncpa [#allocation4 + $0x1], 1 }

</bundles_post_ra>
